<compile_context>
chip_gen: v5e
topology: v5e:2x2
jax: 0.10.0
libtpu: 0.0.40
codegen_flags: <defaults>
</compile_context>

<pallas_src>
import functools

import jax
import jax.numpy as jnp
from jax.experimental import pallas as pl
from jax.experimental.pallas import tpu as pltpu


def _round_up(x, m):
    return (x + m - 1) // m * m


# ----------------------------------------------------------------------------
# Kernel
# ----------------------------------------------------------------------------
def decoder_kernel(ids_ref, h_ref, enc_ref, emb_ref,
                   wih_ref, whh_ref, bih_ref, bhh_ref,
                   wc1_ref, wc2_ref, bc_ref, wo_ref, bo_ref,
                   out_ref, hid_ref):
    Bp, Hp = h_ref.shape
    Op = emb_ref.shape[0]

    # ---- embedding gather as a one-hot MXU matmul (dropout = identity, eval) ----
    ids = ids_ref[...]                                             # (Bp, 1) int32
    one_hot = (jax.lax.broadcasted_iota(jnp.int32, (Bp, Op), 1) == ids)
    x = jnp.dot(one_hot.astype(jnp.bfloat16), emb_ref[...],
                preferred_element_type=jnp.float32).astype(jnp.bfloat16)  # (Bp, Hp)

    h = h_ref[...]                                                 # (Bp, Hp) f32
    h_bf = h.astype(jnp.bfloat16)
    enc = enc_ref[...]                                             # (Bp, L, Hp) bf16

    # ---- GRU cell (single step / single layer), PyTorch gate order r, z, n ----
    gi = jnp.dot(x, wih_ref[...], preferred_element_type=jnp.float32) + bih_ref[...]
    gh = jnp.dot(h_bf, whh_ref[...], preferred_element_type=jnp.float32) + bhh_ref[...]
    r = jax.nn.sigmoid(gi[:, 0:Hp] + gh[:, 0:Hp])
    z = jax.nn.sigmoid(gi[:, Hp:2 * Hp] + gh[:, Hp:2 * Hp])
    n = jnp.tanh(gi[:, 2 * Hp:3 * Hp] + r * gh[:, 2 * Hp:3 * Hp])
    h_new = (1.0 - z) * n + z * h                                  # rnn_output (Bp, Hp)

    # ---- Luong "dot" attention (batched MXU contractions) ----
    h_new_bf = h_new.astype(jnp.bfloat16)
    scores = jnp.einsum('bqh,blh->bql', h_new_bf[:, None, :], enc,
                        preferred_element_type=jnp.float32)        # (Bp, 1, L)
    scores = scores - jnp.max(scores, axis=-1, keepdims=True)
    es = jnp.exp(scores)
    attn = es * pl.reciprocal(jnp.sum(es, axis=-1, keepdims=True), approx=True)
    ctx = jnp.einsum('bql,blh->bqh', attn.astype(jnp.bfloat16), enc,
                     preferred_element_type=jnp.float32)[:, 0, :]  # (Bp, Hp)

    # ---- tanh(concat([rnn_output, context]) @ W_concat.T + b), concat-free ----
    concat_out = jnp.tanh(
        jnp.dot(h_new_bf, wc1_ref[...], preferred_element_type=jnp.float32)
        + jnp.dot(ctx.astype(jnp.bfloat16), wc2_ref[...],
                  preferred_element_type=jnp.float32)
        + bc_ref[...])                                             # (Bp, Hp)

    # ---- output projection + softmax (padded vocab cols carry -1e30 bias) ----
    logits = jnp.dot(concat_out.astype(jnp.bfloat16), wo_ref[...],
                     preferred_element_type=jnp.float32) + bo_ref[...]   # (Bp, Op)
    logits = logits - jnp.max(logits, axis=-1, keepdims=True)
    el = jnp.exp(logits)
    out_ref[...] = el / jnp.sum(el, axis=-1, keepdims=True)        # exact softmax
    hid_ref[...] = h_new


# ----------------------------------------------------------------------------
# One-time preprocessing (weights / encoder outputs)
# ----------------------------------------------------------------------------
def _pad_gru_weight(W, H, Hp):
    """(3H, H) PyTorch weight -> pre-transposed, gate-padded (Hp, 3Hp) bf16."""
    W = jnp.asarray(W, jnp.float32)
    out = jnp.zeros((Hp, 3 * Hp), jnp.float32)
    for g in range(3):
        out = out.at[:H, g * Hp:g * Hp + H].set(W[g * H:(g + 1) * H, :].T)
    return out.astype(jnp.bfloat16)


def _pad_gru_bias(b, H, Hp):
    b = jnp.asarray(b, jnp.float32).reshape(-1)           # (3H,)
    out = jnp.zeros((1, 3 * Hp), jnp.float32)
    for g in range(3):
        out = out.at[0, g * Hp:g * Hp + H].set(b[g * H:(g + 1) * H])
    return out


def prepare_params(params):
    """Pad / pre-transpose / bf16-cast all weights ONCE (not per decode step)."""
    emb = jnp.asarray(params["embedding"], jnp.float32)   # (O, H)
    O, H = emb.shape
    Hp = _round_up(H, 128)
    Op = _round_up(O, 128)
    Wc = jnp.asarray(params["W_concat"], jnp.float32)     # (H, 2H)
    Wo = jnp.asarray(params["W_out"], jnp.float32)        # (O, H)
    return {
        # embedding table padded to (Op, Hp), bf16 (one-hot matmul gather)
        "emb": jnp.zeros((Op, Hp), jnp.float32)
                  .at[:O, :H].set(emb).astype(jnp.bfloat16),
        "w_ih_t": _pad_gru_weight(params["W_ih"], H, Hp),
        "w_hh_t": _pad_gru_weight(params["W_hh"], H, Hp),
        "b_ih": _pad_gru_bias(params["b_ih"], H, Hp),
        "b_hh": _pad_gru_bias(params["b_hh"], H, Hp),
        "wc1_t": jnp.zeros((Hp, Hp), jnp.float32)
                    .at[:H, :H].set(Wc[:, :H].T).astype(jnp.bfloat16),
        "wc2_t": jnp.zeros((Hp, Hp), jnp.float32)
                    .at[:H, :H].set(Wc[:, H:].T).astype(jnp.bfloat16),
        "b_c": jnp.zeros((1, Hp), jnp.float32)
                  .at[0, :H].set(jnp.asarray(params["b_concat"]).reshape(-1)),
        "w_out_t": jnp.zeros((Hp, Op), jnp.float32)
                      .at[:H, :O].set(Wo.T).astype(jnp.bfloat16),
        # padded vocab columns get -1e30 so softmax assigns them ~0 probability
        "b_out": jnp.full((1, Op), -1e30, jnp.float32)
                    .at[0, :O].set(jnp.asarray(params["b_out"]).reshape(-1)),
    }


def prepare_encoder(encoder_outputs):
    """(L, B, H) f32 -> batch-major, lane/sublane-padded (Bp, L, Hp) bf16.
    Done once per source sequence (encoder outputs are constant over decoding)."""
    L, B, H = encoder_outputs.shape
    Hp = _round_up(H, 128)
    Bp = _round_up(B, 8)
    enc = jnp.zeros((Bp, L, Hp), jnp.bfloat16)
    return enc.at[:B, :, :H].set(
        jnp.transpose(encoder_outputs, (1, 0, 2)).astype(jnp.bfloat16))


# ----------------------------------------------------------------------------
# Per-decode-step forward (mirrors LuongAttnDecoderRNN.forward, eval mode)
# ----------------------------------------------------------------------------
def luong_decoder_forward(input_step, last_hidden, enc_prepped, prep,
                          output_size, hidden_size):
    B = input_step.shape[1]
    Bp, L, Hp = enc_prepped.shape
    Op = prep["w_out_t"].shape[1]

    ids = (jnp.zeros((Bp, 1), jnp.int32)
           .at[:B, 0].set(input_step[0].astype(jnp.int32)))
    h_pad = (jnp.zeros((Bp, Hp), jnp.float32)
             .at[:B, :hidden_size].set(last_hidden[0].astype(jnp.float32)))

    vmem = pl.BlockSpec(memory_space=pltpu.MemorySpace.VMEM)

    probs_p, h_new_p = pl.pallas_call(
        decoder_kernel,
        out_shape=(jax.ShapeDtypeStruct((Bp, Op), jnp.float32),
                   jax.ShapeDtypeStruct((Bp, Hp), jnp.float32)),
        in_specs=[vmem] * 13,
        out_specs=(vmem, vmem),
        compiler_params=pltpu.CompilerParams(vmem_limit_bytes=48 * 1024 * 1024),
    )(ids, h_pad, enc_prepped, prep["emb"],
      prep["w_ih_t"], prep["w_hh_t"], prep["b_ih"], prep["b_hh"],
      prep["wc1_t"], prep["wc2_t"], prep["b_c"],
      prep["w_out_t"], prep["b_out"])

    probs = probs_p[:B, :output_size]                       # (B, O)
    hidden = h_new_p[:B, :hidden_size][None]                # (1, B, H)
    return probs, hidden


# ----------------------------------------------------------------------------
# Pure-JAX reference (replicates the PyTorch math, f32)
# ----------------------------------------------------------------------------
def _reference_forward(input_step, last_hidden, encoder_outputs, params):
    emb = params["embedding"][input_step[0]]
    h = last_hidden[0]
    H = h.shape[1]
    gi = emb @ params["W_ih"].T + params["b_ih"]
    gh = h @ params["W_hh"].T + params["b_hh"]
    r = jax.nn.sigmoid(gi[:, :H] + gh[:, :H])
    z = jax.nn.sigmoid(gi[:, H:2 * H] + gh[:, H:2 * H])
    n = jnp.tanh(gi[:, 2 * H:] + r * gh[:, 2 * H:])
    h_new = (1.0 - z) * n + z * h
    enc = jnp.transpose(encoder_outputs, (1, 0, 2))
    scores = jnp.einsum('bh,blh->bl', h_new, enc)
    attn = jax.nn.softmax(scores, axis=1)
    ctx = jnp.einsum('bl,blh->bh', attn, enc)
    cat = jnp.concatenate([h_new, ctx], axis=1)
    co = jnp.tanh(cat @ params["W_concat"].T + params["b_concat"])
    logits = co @ params["W_out"].T + params["b_out"]
    return jax.nn.softmax(logits, axis=1), h_new[None]


if __name__ == "__main__":
    B, H, O, L = 4, 32, 64, 8      # batch, hidden_size, output_size (vocab), src len

    key = jax.random.PRNGKey(0)
    ks = jax.random.split(key, 12)

    params = {
        "embedding": jax.random.normal(ks[0], (O, H), jnp.float32) * 0.1,
        "W_ih":      jax.random.normal(ks[1], (3 * H, H), jnp.float32) * 0.1,
        "W_hh":      jax.random.normal(ks[2], (3 * H, H), jnp.float32) * 0.1,
        "b_ih":      jax.random.normal(ks[3], (1, 3 * H), jnp.float32) * 0.1,
        "b_hh":      jax.random.normal(ks[4], (1, 3 * H), jnp.float32) * 0.1,
        "W_concat":  jax.random.normal(ks[5], (H, 2 * H), jnp.float32) * 0.1,
        "b_concat":  jax.random.normal(ks[6], (1, H), jnp.float32) * 0.1,
        "W_out":     jax.random.normal(ks[7], (O, H), jnp.float32) * 0.1,
        "b_out":     jax.random.normal(ks[8], (1, O), jnp.float32) * 0.1,
    }

    input_step = jax.random.randint(ks[9], (1, B), 0, O, jnp.int32)       # (1, B)
    last_hidden = jax.random.normal(ks[10], (1, B, H), jnp.float32)       # (1, B, H)
    encoder_outputs = jax.random.normal(ks[11], (L, B, H), jnp.float32)   # (L, B, H)

    # One-time preprocessing (per model / per source sequence).
    prep = prepare_params(params)
    enc_prepped = prepare_encoder(encoder_outputs)

    decode_step = jax.jit(functools.partial(
        luong_decoder_forward, prep=prep, output_size=O, hidden_size=H))

    probs, hidden = decode_step(input_step, last_hidden, enc_prepped)
    jax.block_until_ready((probs, hidden))

    ref_probs, ref_hidden = _reference_forward(input_step, last_hidden,
                                               encoder_outputs, params)
    assert probs.shape == (B, O) and hidden.shape == (1, B, H)
    # bf16 matmul operands (f32 accumulation) -> compare with relaxed tolerance.
    assert jnp.allclose(probs, ref_probs, atol=2e-2, rtol=2e-2)
    assert jnp.allclose(hidden, ref_hidden, atol=2e-2, rtol=2e-2)
    assert jnp.allclose(jnp.sum(probs, axis=1), 1.0, atol=1e-4)

    print("KERNEL_OK")
</pallas_src>

<mosaic_0001>
module attributes {stable_mosaic.version = 11 : i64} {
  func.func @decoder_kernel(%arg0: memref<8x1xi32, #tpu.memory_space<vmem>>, %arg1: memref<8x128xf32, #tpu.memory_space<vmem>>, %arg2: memref<8x8x128xbf16, #tpu.memory_space<vmem>>, %arg3: memref<128x128xbf16, #tpu.memory_space<vmem>>, %arg4: memref<128x384xbf16, #tpu.memory_space<vmem>>, %arg5: memref<128x384xbf16, #tpu.memory_space<vmem>>, %arg6: memref<1x384xf32, #tpu.memory_space<vmem>>, %arg7: memref<1x384xf32, #tpu.memory_space<vmem>>, %arg8: memref<128x128xbf16, #tpu.memory_space<vmem>>, %arg9: memref<128x128xbf16, #tpu.memory_space<vmem>>, %arg10: memref<1x128xf32, #tpu.memory_space<vmem>>, %arg11: memref<128x128xbf16, #tpu.memory_space<vmem>>, %arg12: memref<1x128xf32, #tpu.memory_space<vmem>>, %arg13: memref<8x128xf32, #tpu.memory_space<vmem>>, %arg14: memref<8x128xf32, #tpu.memory_space<vmem>>) attributes {dimension_semantics = [], scalar_prefetch = 0 : i64, scratch_operands = 0 : i64, tpu.core_type = #tpu.core_type<tc>} {
    %c0 = arith.constant 0 : index
    %c0_0 = arith.constant 0 : index
    %0 = vector.load %arg0[%c0, %c0_0] : memref<8x1xi32, #tpu.memory_space<vmem>>, vector<8x1xi32>
    %1 = tpu.iota {dimensions = array<i32: 1>} : vector<8x128xi32>
    %2 = vector.broadcast %0 : vector<8x1xi32> to vector<8x128xi32>
    %3 = arith.cmpi eq, %1, %2 : vector<8x128xi32>
    %4 = arith.extui %3 : vector<8x128xi1> to vector<8x128xi32>
    %5 = arith.sitofp %4 : vector<8x128xi32> to vector<8x128xf32>
    %6 = arith.truncf %5 : vector<8x128xf32> to vector<8x128xbf16>
    %c0_1 = arith.constant 0 : index
    %c0_2 = arith.constant 0 : index
    %7 = vector.load %arg3[%c0_1, %c0_2] : memref<128x128xbf16, #tpu.memory_space<vmem>>, vector<128x128xbf16>
    %cst = arith.constant dense<0.000000e+00> : vector<8x128xf32>
    %8 = tpu.matmul %6, %7, %cst {dimension_numbers = #tpu.dot_dimension_numbers<[1], [0], [0], [1], [0, 0, 1, 1], [], []>} : vector<8x128xbf16>, vector<128x128xbf16>, vector<8x128xf32> -> vector<8x128xf32>
    %9 = arith.truncf %8 : vector<8x128xf32> to vector<8x128xbf16>
    %c0_3 = arith.constant 0 : index
    %c0_4 = arith.constant 0 : index
    %10 = vector.load %arg1[%c0_3, %c0_4] : memref<8x128xf32, #tpu.memory_space<vmem>>, vector<8x128xf32>
    %11 = arith.truncf %10 : vector<8x128xf32> to vector<8x128xbf16>
    %c0_5 = arith.constant 0 : index
    %c0_6 = arith.constant 0 : index
    %c0_7 = arith.constant 0 : index
    %12 = vector.load %arg2[%c0_5, %c0_6, %c0_7] : memref<8x8x128xbf16, #tpu.memory_space<vmem>>, vector<8x8x128xbf16>
    %c0_8 = arith.constant 0 : index
    %c0_9 = arith.constant 0 : index
    %13 = vector.load %arg4[%c0_8, %c0_9] : memref<128x384xbf16, #tpu.memory_space<vmem>>, vector<128x384xbf16>
    %cst_10 = arith.constant dense<0.000000e+00> : vector<8x384xf32>
    %14 = tpu.matmul %9, %13, %cst_10 {dimension_numbers = #tpu.dot_dimension_numbers<[1], [0], [0], [1], [0, 0, 1, 1], [], []>} : vector<8x128xbf16>, vector<128x384xbf16>, vector<8x384xf32> -> vector<8x384xf32>
    %c0_11 = arith.constant 0 : index
    %c0_12 = arith.constant 0 : index
    %15 = vector.load %arg6[%c0_11, %c0_12] : memref<1x384xf32, #tpu.memory_space<vmem>>, vector<1x384xf32>
    %16 = vector.broadcast %15 : vector<1x384xf32> to vector<8x384xf32>
    %17 = arith.addf %14, %16 : vector<8x384xf32>
    %c0_13 = arith.constant 0 : index
    %c0_14 = arith.constant 0 : index
    %18 = vector.load %arg5[%c0_13, %c0_14] : memref<128x384xbf16, #tpu.memory_space<vmem>>, vector<128x384xbf16>
    %cst_15 = arith.constant dense<0.000000e+00> : vector<8x384xf32>
    %19 = tpu.matmul %11, %18, %cst_15 {dimension_numbers = #tpu.dot_dimension_numbers<[1], [0], [0], [1], [0, 0, 1, 1], [], []>} : vector<8x128xbf16>, vector<128x384xbf16>, vector<8x384xf32> -> vector<8x384xf32>
    %c0_16 = arith.constant 0 : index
    %c0_17 = arith.constant 0 : index
    %20 = vector.load %arg7[%c0_16, %c0_17] : memref<1x384xf32, #tpu.memory_space<vmem>>, vector<1x384xf32>
    %21 = vector.broadcast %20 : vector<1x384xf32> to vector<8x384xf32>
    %22 = arith.addf %19, %21 : vector<8x384xf32>
    %23 = vector.extract_strided_slice %17 {offsets = [0, 0], sizes = [8, 128], strides = [1, 1]} : vector<8x384xf32> to vector<8x128xf32>
    %24 = vector.extract_strided_slice %22 {offsets = [0, 0], sizes = [8, 128], strides = [1, 1]} : vector<8x384xf32> to vector<8x128xf32>
    %25 = arith.addf %23, %24 : vector<8x128xf32>
    %26 = arith.negf %25 : vector<8x128xf32>
    %27 = math.exp %26 : vector<8x128xf32>
    %cst_18 = arith.constant 1.000000e+00 : f32
    %28 = vector.broadcast %cst_18 : f32 to vector<8x128xf32>
    %29 = arith.addf %28, %27 : vector<8x128xf32>
    %30 = arith.divf %28, %29 : vector<8x128xf32>
    %31 = vector.extract_strided_slice %17 {offsets = [0, 128], sizes = [8, 128], strides = [1, 1]} : vector<8x384xf32> to vector<8x128xf32>
    %32 = vector.extract_strided_slice %22 {offsets = [0, 128], sizes = [8, 128], strides = [1, 1]} : vector<8x384xf32> to vector<8x128xf32>
    %33 = arith.addf %31, %32 : vector<8x128xf32>
    %34 = arith.negf %33 : vector<8x128xf32>
    %35 = math.exp %34 : vector<8x128xf32>
    %cst_19 = arith.constant 1.000000e+00 : f32
    %36 = vector.broadcast %cst_19 : f32 to vector<8x128xf32>
    %37 = arith.addf %36, %35 : vector<8x128xf32>
    %38 = arith.divf %36, %37 : vector<8x128xf32>
    %39 = vector.extract_strided_slice %17 {offsets = [0, 256], sizes = [8, 128], strides = [1, 1]} : vector<8x384xf32> to vector<8x128xf32>
    %40 = vector.extract_strided_slice %22 {offsets = [0, 256], sizes = [8, 128], strides = [1, 1]} : vector<8x384xf32> to vector<8x128xf32>
    %41 = arith.mulf %30, %40 : vector<8x128xf32>
    %42 = arith.addf %39, %41 : vector<8x128xf32>
    %43 = math.tanh %42 : vector<8x128xf32>
    %cst_20 = arith.constant 1.000000e+00 : f32
    %44 = vector.broadcast %cst_20 : f32 to vector<8x128xf32>
    %45 = arith.subf %44, %38 : vector<8x128xf32>
    %46 = arith.mulf %45, %43 : vector<8x128xf32>
    %47 = arith.mulf %38, %10 : vector<8x128xf32>
    %48 = arith.addf %46, %47 : vector<8x128xf32>
    %49 = arith.truncf %48 : vector<8x128xf32> to vector<8x128xbf16>
    %50 = vector.shape_cast %49 : vector<8x128xbf16> to vector<8x1x128xbf16>
    "tpu.trace_start"() <{level = 10 : i32, message = "bqh,blh->bql"}> : () -> ()
    %cst_21 = arith.constant dense<0.000000e+00> : vector<8x1x8xf32>
    %51 = tpu.matmul %50, %12, %cst_21 {dimension_numbers = #tpu.dot_dimension_numbers<[2], [2], [1], [1], [0, 0, 0, 1, 1, 1], [0], [0]>} : vector<8x1x128xbf16>, vector<8x8x128xbf16>, vector<8x1x8xf32> -> vector<8x1x8xf32>
    "tpu.trace_stop"() : () -> ()
    %cst_22 = arith.constant dense<0xFF800000> : vector<8x1xf32>
    %52 = vector.multi_reduction <maximumf>, %51, %cst_22 [2] : vector<8x1x8xf32> to vector<8x1xf32>
    %53 = vector.shape_cast %52 : vector<8x1xf32> to vector<8x1x1xf32>
    %54 = vector.broadcast %53 : vector<8x1x1xf32> to vector<8x1x8xf32>
    %55 = arith.subf %51, %54 : vector<8x1x8xf32>
    %56 = math.exp %55 : vector<8x1x8xf32>
    %cst_23 = arith.constant dense<0.000000e+00> : vector<8x1xf32>
    %57 = vector.multi_reduction <add>, %56, %cst_23 [2] : vector<8x1x8xf32> to vector<8x1xf32>
    %58 = vector.shape_cast %57 : vector<8x1xf32> to vector<8x1x1xf32>
    %59 = tpu.reciprocal %58 {approx = true} : vector<8x1x1xf32> -> vector<8x1x1xf32>
    %60 = vector.broadcast %59 : vector<8x1x1xf32> to vector<8x1x8xf32>
    %61 = arith.mulf %56, %60 : vector<8x1x8xf32>
    %62 = arith.truncf %61 : vector<8x1x8xf32> to vector<8x1x8xbf16>
    "tpu.trace_start"() <{level = 10 : i32, message = "bql,blh->bqh"}> : () -> ()
    %cst_24 = arith.constant dense<0.000000e+00> : vector<8x1x128xf32>
    %63 = tpu.matmul %62, %12, %cst_24 {dimension_numbers = #tpu.dot_dimension_numbers<[2], [1], [1], [2], [0, 0, 0, 1, 1, 2], [0], [0]>} : vector<8x1x8xbf16>, vector<8x8x128xbf16>, vector<8x1x128xf32> -> vector<8x1x128xf32>
    "tpu.trace_stop"() : () -> ()
    %64 = vector.shape_cast %63 : vector<8x1x128xf32> to vector<8x128xf32>
    %c0_25 = arith.constant 0 : index
    %c0_26 = arith.constant 0 : index
    %65 = vector.load %arg8[%c0_25, %c0_26] : memref<128x128xbf16, #tpu.memory_space<vmem>>, vector<128x128xbf16>
    %cst_27 = arith.constant dense<0.000000e+00> : vector<8x128xf32>
    %66 = tpu.matmul %49, %65, %cst_27 {dimension_numbers = #tpu.dot_dimension_numbers<[1], [0], [0], [1], [0, 0, 1, 1], [], []>} : vector<8x128xbf16>, vector<128x128xbf16>, vector<8x128xf32> -> vector<8x128xf32>
    %67 = arith.truncf %64 : vector<8x128xf32> to vector<8x128xbf16>
    %c0_28 = arith.constant 0 : index
    %c0_29 = arith.constant 0 : index
    %68 = vector.load %arg9[%c0_28, %c0_29] : memref<128x128xbf16, #tpu.memory_space<vmem>>, vector<128x128xbf16>
    %cst_30 = arith.constant dense<0.000000e+00> : vector<8x128xf32>
    %69 = tpu.matmul %67, %68, %cst_30 {dimension_numbers = #tpu.dot_dimension_numbers<[1], [0], [0], [1], [0, 0, 1, 1], [], []>} : vector<8x128xbf16>, vector<128x128xbf16>, vector<8x128xf32> -> vector<8x128xf32>
    %70 = arith.addf %66, %69 : vector<8x128xf32>
    %c0_31 = arith.constant 0 : index
    %c0_32 = arith.constant 0 : index
    %71 = vector.load %arg10[%c0_31, %c0_32] : memref<1x128xf32, #tpu.memory_space<vmem>>, vector<1x128xf32>
    %72 = vector.broadcast %71 : vector<1x128xf32> to vector<8x128xf32>
    %73 = arith.addf %70, %72 : vector<8x128xf32>
    %74 = math.tanh %73 : vector<8x128xf32>
    %75 = arith.truncf %74 : vector<8x128xf32> to vector<8x128xbf16>
    %c0_33 = arith.constant 0 : index
    %c0_34 = arith.constant 0 : index
    %76 = vector.load %arg11[%c0_33, %c0_34] : memref<128x128xbf16, #tpu.memory_space<vmem>>, vector<128x128xbf16>
    %cst_35 = arith.constant dense<0.000000e+00> : vector<8x128xf32>
    %77 = tpu.matmul %75, %76, %cst_35 {dimension_numbers = #tpu.dot_dimension_numbers<[1], [0], [0], [1], [0, 0, 1, 1], [], []>} : vector<8x128xbf16>, vector<128x128xbf16>, vector<8x128xf32> -> vector<8x128xf32>
    %c0_36 = arith.constant 0 : index
    %c0_37 = arith.constant 0 : index
    %78 = vector.load %arg12[%c0_36, %c0_37] : memref<1x128xf32, #tpu.memory_space<vmem>>, vector<1x128xf32>
    %79 = vector.broadcast %78 : vector<1x128xf32> to vector<8x128xf32>
    %80 = arith.addf %77, %79 : vector<8x128xf32>
    %cst_38 = arith.constant dense<0xFF800000> : vector<8xf32>
    %81 = vector.multi_reduction <maximumf>, %80, %cst_38 [1] : vector<8x128xf32> to vector<8xf32>
    %82 = vector.shape_cast %81 : vector<8xf32> to vector<8x1xf32>
    %83 = vector.broadcast %82 : vector<8x1xf32> to vector<8x128xf32>
    %84 = arith.subf %80, %83 : vector<8x128xf32>
    %85 = math.exp %84 : vector<8x128xf32>
    %cst_39 = arith.constant dense<0.000000e+00> : vector<8xf32>
    %86 = vector.multi_reduction <add>, %85, %cst_39 [1] : vector<8x128xf32> to vector<8xf32>
    %87 = vector.shape_cast %86 : vector<8xf32> to vector<8x1xf32>
    %88 = vector.broadcast %87 : vector<8x1xf32> to vector<8x128xf32>
    %89 = arith.divf %85, %88 : vector<8x128xf32>
    %c0_40 = arith.constant 0 : index
    %c0_41 = arith.constant 0 : index
    %90 = vector.load %arg13[%c0_40, %c0_41] : memref<8x128xf32, #tpu.memory_space<vmem>>, vector<8x128xf32>
    tpu.vector_store %arg13[%c0_40, %c0_41], %89 {strides = array<i32>} : memref<8x128xf32, #tpu.memory_space<vmem>>, vector<8x128xf32>,
    %c0_42 = arith.constant 0 : index
    %c0_43 = arith.constant 0 : index
    %91 = vector.load %arg14[%c0_42, %c0_43] : memref<8x128xf32, #tpu.memory_space<vmem>>, vector<8x128xf32>
    tpu.vector_store %arg14[%c0_42, %c0_43], %48 {strides = array<i32>} : memref<8x128xf32, #tpu.memory_space<vmem>>, vector<8x128xf32>,
    return
  }
}

</mosaic_0001>

<bundles_post_ra>
// kernel: luong_decoder_forward.1
= control target key start
LH: loop header
LB: loop body
LE: loop exit
PB: predicated region body
PF: predicated region fallthrough
CT: control target
= control target key end

     0   :  { %20 = vsyncpa [#allocation3], 0  ;;  %s2369_s0 = inlined_call_operand.vmem [shape: s32[8,1], index: 0, kind: input, shape index: {}]   ;;  %s2370_s1 = inlined_call_operand.vmem [shape: f32[8,128], index: 1, kind: input, shape index: {}]   ;;  %s2371_s2 = inlined_call_operand.hbm [shape: bf16[8,8,128], index: 2, kind: input, shape index: {}]   ;;  %s2372_s3 = inlined_call_operand.hbm [shape: bf16[128,128], index: 3, kind: input, shape index: {}]   ;;  %s2373_s4 = inlined_call_operand.hbm [shape: bf16[128,384], index: 4, kind: input, shape index: {}]   ;;  %s2374_s5 = inlined_call_operand.hbm [shape: bf16[128,384], index: 5, kind: input, shape index: {}]   ;;  %s2375_s6 = inlined_call_operand.vmem [shape: f32[1,384], index: 6, kind: input, shape index: {}]   ;;  %s2376_s7 = inlined_call_operand.vmem [shape: f32[1,384], index: 7, kind: input, shape index: {}]   ;;  %s2377_s8 = inlined_call_operand.hbm [shape: bf16[128,128], index: 8, kind: input, shape index: {}]   ;;  %s2378_s9 = inlined_call_operand.hbm [shape: bf16[128,128], index: 9, kind: input, shape index: {}]   ;;  %s2379_s10 = inlined_call_operand.vmem [shape: f32[1,128], index: 10, kind: input, shape index: {}]   ;;  %s2380_s11 = inlined_call_operand.hbm [shape: bf16[128,128], index: 11, kind: input, shape index: {}]   ;;  %s2381_s12 = inlined_call_operand.vmem [shape: f32[1,128], index: 12, kind: input, shape index: {}]   ;;  %s2382_s13 = inlined_call_operand.vmem [shape: f32[8,128], index: 13, kind: output, shape index: {0}]   ;;  %s2383_s14 = inlined_call_operand.vmem [shape: f32[8,128], index: 14, kind: output, shape index: {1}]  }
   0x1   :  { %21 = vsyncpa [#allocation5], 0 }
   0x2   :  { %22 = vsyncpa [#allocation8], 0 }
   0x3   :  { %23 = vsyncpa [#allocation11], 0  ;;  %s45_s15 = sshll.u32 %s2372_s3, 4  ;;  %s2101_s16 = smov [#allocation4]   ;;  %s46_s15 = int_to_ptr.hbm [resolvable:$true] %s45_s15 }
   0x4   :  { %s47_s17 = sshll.u32 %s2101_s16, 4  ;;  %s2102_s18 = smov 64   ;;  %s48_s17 = int_to_ptr.vmem [resolvable:$true] %s47_s17 }
   0x5   :  { %s2103_s19 = smov 4   ;;  %s71_s22 = sshll.u32 %s2374_s5, 4  ;;  %s72_s22 = int_to_ptr.hbm [resolvable:$true] %s71_s22 }
   0x6   :  { %53 = dma.hbm_to_vmem [thread:$0]  %s46_s15, 1024, %s48_s17, [#allocation5], %s2102_s18, %s2102_s18, %s2103_s19  }
   0x7   :  { %s2104_s23 = smov [#allocation7]   ;;  %s101_s3 = sshll.u32 %s2378_s9, 4  ;;  %s102_s3 = int_to_ptr.hbm [resolvable:$true] %s101_s3 }
   0x8   :  { %s73_s24 = sshll.u32 %s2104_s23, 4  ;;  %s2105_s27 = smov 192   ;;  %s74_s24 = int_to_ptr.vmem [resolvable:$true] %s73_s24 }
   0x9   :  { %s2106_s28 = smov 12   ;;  %s32_s15 = sshll.u32 %s2371_s2, 4  ;;  %s33_s15 = int_to_ptr.hbm [resolvable:$true] %s32_s15 }
   0xa   :  { %79 = dma.hbm_to_vmem [thread:$0]  %s72_s22, 3072, %s74_s24, [#allocation8], %s2105_s27, %s2105_s27, %s2106_s28  }
   0xb   :  { %s2107_s16 = smov [#allocation10]   ;;  %s2108_s5 = smov [#allocation2]  }
   0xc   :  { %s103_s17 = sshll.u32 %s2107_s16, 4  ;;  %s34_s20 = sshll.u32 %s2108_s5, 4  ;;  %s104_s17 = int_to_ptr.vmem [resolvable:$true] %s103_s17  ;;  %s35_s20 = int_to_ptr.vmem [resolvable:$true] %s34_s20 }
   0xd   :  { %109 = dma.hbm_to_vmem [thread:$0]  %s102_s3, 1024, %s104_s17, [#allocation11], %s2102_s18, %s2102_s18, %s2103_s19  }
   0xe   :  { %s58_s23 = sshll.u32 %s2373_s4, 4  ;;  %s88_s24 = sshll.u32 %s2377_s8, 4  ;;  %s59_s23 = int_to_ptr.hbm [resolvable:$true] %s58_s23  ;;  %s89_s24 = int_to_ptr.hbm [resolvable:$true] %s88_s24 }
   0xf   :  { %40 = dma.hbm_to_vmem [thread:$0]  %s33_s15, 512, %s35_s20, [#allocation3], %s2102_s18, %s2102_s18, %s2103_s19  }
  0x10   :  { %s2109_s25 = smov [#allocation6]   ;;  %s2110_s3 = smov [#allocation9]  }
  0x11   :  { %s60_s26 = sshll.u32 %s2109_s25, 4  ;;  %s90_s29 = sshll.u32 %s2110_s3, 4  ;;  %s61_s26 = int_to_ptr.vmem [resolvable:$true] %s60_s26  ;;  %s91_s29 = int_to_ptr.vmem [resolvable:$true] %s90_s29 }
  0x12   :  { %66 = dma.hbm_to_vmem [thread:$0]  %s59_s23, 3072, %s61_s26, [#allocation5], %s2105_s27, %s2105_s27, %s2106_s28  }
  0x13   :  { %s116_s4 = sshll.u32 %s2380_s11, 4  ;;  %s2111_s15 = smov [#allocation12]   ;;  %s117_s4 = int_to_ptr.hbm [resolvable:$true] %s116_s4 }
  0x14   :  { %96 = dma.hbm_to_vmem [thread:$0]  %s89_s24, 1024, %s91_s29, [#allocation8], %s2102_s18, %s2102_s18, %s2103_s19  }
  0x15   :  { %s118_s17 = sshll.u32 %s2111_s15, 4  ;;  %s119_s17 = int_to_ptr.vmem [resolvable:$true] %s118_s17 }
  0x16   :  { %124 = dma.hbm_to_vmem [thread:$0]  %s117_s4, 1024, %s119_s17, [#allocation11], %s2102_s18, %s2102_s18, %s2103_s19  }
  0x17   :  { %2093 = dma.done.wait [#allocation3], 512  }
  0x18   :  { %2094 = vsyncadd [#allocation3], 4294966784 }
  0x19   :  { %2095 = dma.done.wait [#allocation5], 4096  }
  0x1a   :  { %2096 = vsyncadd [#allocation5], 4294963200 }
  0x1b   :  { %2097 = dma.done.wait [#allocation8], 4096  }
  0x1c   :  { %2098 = vsyncadd [#allocation8], 4294963200 }
  0x1d   :  { %2099 = dma.done.wait [#allocation11], 2048  }
  0x1e   :  { %2100 = vsyncadd [#allocation11], 4294965248  ;;  %v2112_v0 = vmov 0   ;;  %v156_v1 = vld [vmem:[%s2369_s0] sm:$0xff]  ;;  %v1788_v2 = vld [vmem:[#allocation4 + $0x38] sm:$0xff]  ;;  %vm972_vm2 = vcmask 1043456  }
  0x1f   :  { %1874 = vset.pattern.permute.xlu0 %v2112_v0  ;;  %230 = vmatpush.bf16.msra.mxu0 %v1788_v2  ;;  %v1787_v3 = vld [vmem:[#allocation4 + $0x30] sm:$0xff]  ;;  %v1786_v4 = vld [vmem:[#allocation4 + $0x28] sm:$0xff]  ;;  %v1785_v5 = vld [vmem:[#allocation4 + $0x20] sm:$0xff]  ;;  %vm718_vm11 = vcmask 1040384   ;;  %vm723_vm12 = vcmask 1041409   ;;  %vm727_vm13 = vcmask 1042434  }
  0x20   :  { %160 = vperm.xlu0 %1874, %v156_v1   ;;  %v1784_v6 = vld [vmem:[#allocation4 + $0x18] sm:$0xff]  ;;  %v1783_v7 = vld [vmem:[#allocation4 + $0x10] sm:$0xff]  ;;  %v1782_v8 = vld [vmem:[#allocation4 + $0x8] sm:$0xff]  ;;  %vm731_vm14 = vcmask 1043459   ;;  %vm871_vm15 = vcmask 57344  }
  0x21   :  { %v1781_v9 = vld [vmem:[#allocation4] sm:$0xff]  ;;  %v1565_v10 = vld [vmem:[#allocation6 + $0xa8] sm:$0xf]  ;;  %v1811_v11 = vld [vmem:[#allocation6 + $0xb0] sm:$0xf0] }
  0x22   :  { %v1553_v12 = vld [vmem:[#allocation6 + $0x90] sm:$0xf]  ;;  %v1566_v13 = vor.u32 %v1811_v11, %v1565_v10  ;;  %v1808_v14 = vld [vmem:[#allocation6 + $0x98] sm:$0xf0]  ;;  %v1810_v15 = vld [vmem:[#allocation6 + $0xac] sm:$0xf] }
  0x23   :  { %231 = vmatpush.bf16.msra.mxu0 %v1787_v3  ;;  %v1567_v16 = vld [vmem:[#allocation6 + $0xb4] sm:$0xf0]  ;;  %v1807_v18 = vld [vmem:[#allocation6 + $0x94] sm:$0xf]  ;;  %v1554_v19 = vor.u32 %v1808_v14, %v1553_v12  ;;  %v1805_v21 = vld [vmem:[#allocation6 + $0x80] sm:$0xf0] }
  0x24   :  { %v1570_v17 = vor.u32 %v1810_v15, %v1567_v16  ;;  %422 = vmatpush.bf16.msra.mxu1 %v1566_v13  ;;  %v1541_v20 = vld [vmem:[#allocation6 + $0x78] sm:$0xf]  ;;  %v1555_v22 = vld [vmem:[#allocation6 + $0x9c] sm:$0xf0]  ;;  %v1661_v24 = vld [vmem:[#allocation7 + $0xa8] sm:$0xf] }
  0x25   :  { %v1558_v23 = vor.u32 %v1807_v18, %v1555_v22  ;;  %v1835_v25 = vld [vmem:[#allocation7 + $0xb0] sm:$0xf0]  ;;  %v1573_v26 = vld [vmem:[#allocation6 + $0xb0] sm:$0xf]  ;;  %v1812_v28 = vld [vmem:[#allocation6 + $0xb8] sm:$0xf0]  ;;  %v1542_v33 = vor.u32 %v1805_v21, %v1541_v20 }
  0x26   :  { %435 = vmatpush.bf16.msra.mxu2 %v1570_v17  ;;  %v1662_v27 = vor.u32 %v1835_v25, %v1661_v24  ;;  %v1804_v29 = vld [vmem:[#allocation6 + $0x7c] sm:$0xf]  ;;  %v1543_v30 = vld [vmem:[#allocation6 + $0x84] sm:$0xf0]  ;;  %v1574_v31 = vor.u32 %v1812_v28, %v1573_v26  ;;  %v1649_v32 = vld [vmem:[#allocation7 + $0x90] sm:$0xf] }
  0x27   :  { %232 = vmatpush.bf16.msra.mxu0 %v1786_v4  ;;  %v1832_v34 = vld [vmem:[#allocation7 + $0x98] sm:$0xf0]  ;;  %v1561_v35 = vld [vmem:[#allocation6 + $0x98] sm:$0xf]  ;;  %v1809_v36 = vld [vmem:[#allocation6 + $0xa0] sm:$0xf0]  ;;  %v1546_v39 = vor.u32 %v1804_v29, %v1543_v30 }
  0x28   :  { %423 = vmatpush.bf16.msra.mxu1 %v1554_v19  ;;  %v1529_v37 = vld [vmem:[#allocation6 + $0x60] sm:$0xf]  ;;  %v1802_v38 = vld [vmem:[#allocation6 + $0x68] sm:$0xf0]  ;;  %448 = vmatpush.bf16.msra.mxu3 %v1574_v31  ;;  %v1650_v40 = vor.u32 %v1832_v34, %v1649_v32  ;;  %v1562_v41 = vor.u32 %v1809_v36, %v1561_v35  ;;  %v1801_v42 = vld [vmem:[#allocation6 + $0x64] sm:$0xf] }
  0x29   :  { %v1531_v43 = vld [vmem:[#allocation6 + $0x6c] sm:$0xf0]  ;;  %v1637_v44 = vld [vmem:[#allocation7 + $0x78] sm:$0xf]  ;;  %v1829_v45 = vld [vmem:[#allocation7 + $0x80] sm:$0xf0]  ;;  %v1530_v48 = vor.u32 %v1802_v38, %v1529_v37 }
  0x2a   :  { %436 = vmatpush.bf16.msra.mxu2 %v1558_v23  ;;  %v1549_v46 = vld [vmem:[#allocation6 + $0x80] sm:$0xf]  ;;  %v1806_v47 = vld [vmem:[#allocation6 + $0x88] sm:$0xf0]  ;;  %v1517_v49 = vld [vmem:[#allocation6 + $0x48] sm:$0xf]  ;;  %v1638_v51 = vor.u32 %v1829_v45, %v1637_v44  ;;  %v1534_v52 = vor.u32 %v1801_v42, %v1531_v43 }
  0x2b   :  { %233 = vmatpush.bf16.msra.mxu0 %v1785_v5  ;;  %v1799_v50 = vld [vmem:[#allocation6 + $0x50] sm:$0xf0]  ;;  %v1550_v53 = vor.u32 %v1806_v47, %v1549_v46  ;;  %v1798_v54 = vld [vmem:[#allocation6 + $0x4c] sm:$0xf]  ;;  %v1625_v55 = vld [vmem:[#allocation7 + $0x60] sm:$0xf] }
  0x2c   :  { %424 = vmatpush.bf16.msra.mxu1 %v1542_v33  ;;  %449 = vmatpush.bf16.msra.mxu3 %v1562_v41  ;;  %v1826_v56 = vld [vmem:[#allocation7 + $0x68] sm:$0xf0]  ;;  %v1519_v57 = vld [vmem:[#allocation6 + $0x54] sm:$0xf0]  ;;  %v1537_v58 = vld [vmem:[#allocation6 + $0x68] sm:$0xf]  ;;  %v1518_v60 = vor.u32 %v1799_v50, %v1517_v49 }
  0x2d   :  { %v1803_v59 = vld [vmem:[#allocation6 + $0x70] sm:$0xf0]  ;;  %v1505_v61 = vld [vmem:[#allocation6 + $0x30] sm:$0xf]  ;;  %v1796_v62 = vld [vmem:[#allocation6 + $0x38] sm:$0xf0]  ;;  %v1626_v63 = vor.u32 %v1826_v56, %v1625_v55  ;;  %v1522_v0 = vor.u32 %v1798_v54, %v1519_v57 }
  0x2e   :  { %437 = vmatpush.bf16.msra.mxu2 %v1546_v39  ;;  %v1538_v1 = vor.u32 %v1803_v59, %v1537_v58  ;;  %v1795_v2 = vld [vmem:[#allocation6 + $0x34] sm:$0xf]  ;;  %v1613_v3 = vld [vmem:[#allocation7 + $0x48] sm:$0xf]  ;;  %v1507_v5 = vld [vmem:[#allocation6 + $0x3c] sm:$0xf0] }
  0x2f   :  { %234 = vmatpush.bf16.msra.mxu0 %v1784_v6  ;;  %v1823_v4 = vld [vmem:[#allocation7 + $0x50] sm:$0xf0]  ;;  %v1525_v6 = vld [vmem:[#allocation6 + $0x50] sm:$0xf]  ;;  %v1493_v10 = vld [vmem:[#allocation6 + $0x18] sm:$0xf]  ;;  %v1510_v13 = vor.u32 %v1795_v2, %v1507_v5 }
  0x30   :  { %425 = vmatpush.bf16.msra.mxu1 %v1530_v48  ;;  %450 = vmatpush.bf16.msra.mxu3 %v1550_v53  ;;  %v1793_v11 = vld [vmem:[#allocation6 + $0x20] sm:$0xf0]  ;;  %v1614_v12 = vor.u32 %v1823_v4, %v1613_v3  ;;  %v1792_v15 = vld [vmem:[#allocation6 + $0x1c] sm:$0xf]  ;;  %v1601_v16 = vld [vmem:[#allocation7 + $0x30] sm:$0xf] }
  0x31   :  { %v1820_v17 = vld [vmem:[#allocation7 + $0x38] sm:$0xf0]  ;;  %v1495_v18 = vld [vmem:[#allocation6 + $0x24] sm:$0xf0]  ;;  %v1513_v19 = vld [vmem:[#allocation6 + $0x38] sm:$0xf]  ;;  %v1494_v22 = vor.u32 %v1793_v11, %v1493_v10 }
  0x32   :  { %438 = vmatpush.bf16.msra.mxu2 %v1534_v52  ;;  %v1797_v20 = vld [vmem:[#allocation6 + $0x40] sm:$0xf0]  ;;  %v1481_v23 = vld [vmem:[#allocation6] sm:$0xf]  ;;  %v1602_v24 = vor.u32 %v1820_v17, %v1601_v16  ;;  %v1790_v25 = vld [vmem:[#allocation6 + $0x8] sm:$0xf0]  ;;  %v1498_v26 = vor.u32 %v1792_v15, %v1495_v18 }
  0x33   :  { %235 = vmatpush.bf16.msra.mxu0 %v1783_v7  ;;  %v1800_v7 = vld [vmem:[#allocation6 + $0x58] sm:$0xf0]  ;;  %v1589_v28 = vld [vmem:[#allocation7 + $0x18] sm:$0xf]  ;;  %v1817_v29 = vld [vmem:[#allocation7 + $0x20] sm:$0xf0]  ;;  %v1482_v36 = vor.u32 %v1790_v25, %v1481_v23 }
  0x34   :  { %426 = vmatpush.bf16.msra.mxu1 %v1518_v60  ;;  %451 = vmatpush.bf16.msra.mxu3 %v1538_v1  ;;  %v1526_v14 = vor.u32 %v1800_v7, %v1525_v6  ;;  %v1834_v30 = vld [vmem:[#allocation7 + $0xac] sm:$0xf]  ;;  %v1663_v31 = vld [vmem:[#allocation7 + $0xb4] sm:$0xf0]  ;;  %v1789_v32 = vld [vmem:[#allocation6 + $0x4] sm:$0xf]  ;;  %v1590_v37 = vor.u32 %v1817_v29, %v1589_v28 }
  0x35   :  { %v1483_v33 = vld [vmem:[#allocation6 + $0xc] sm:$0xf0]  ;;  %v1501_v34 = vld [vmem:[#allocation6 + $0x20] sm:$0xf]  ;;  %v1794_v35 = vld [vmem:[#allocation6 + $0x28] sm:$0xf0] }
  0x36   :  { %439 = vmatpush.bf16.msra.mxu2 %v1522_v0  ;;  %v1669_v38 = vld [vmem:[#allocation7 + $0xb0] sm:$0xf]  ;;  %v1836_v39 = vld [vmem:[#allocation7 + $0xb8] sm:$0xf0]  ;;  %v1577_v41 = vld [vmem:[#allocation7] sm:$0xf]  ;;  %v1486_v46 = vor.u32 %v1789_v32, %v1483_v33  ;;  %v1502_v47 = vor.u32 %v1794_v35, %v1501_v34 }
  0x37   :  { %236 = vmatpush.bf16.msra.mxu0 %v1782_v8  ;;  %v157_v8 = vlaneseq  ;;  %v1814_v42 = vld [vmem:[#allocation7 + $0x8] sm:$0xf0]  ;;  %v1831_v44 = vld [vmem:[#allocation7 + $0x94] sm:$0xf]  ;;  %v1651_v45 = vld [vmem:[#allocation7 + $0x9c] sm:$0xf0]  ;;  %v1670_v48 = vor.u32 %v1836_v39, %v1669_v38 }
  0x38   :  { %452 = vmatpush.bf16.msra.mxu3 %v1526_v14  ;;  %v1578_v49 = vor.u32 %v1814_v42, %v1577_v41  ;;  %v1657_v50 = vld [vmem:[#allocation7 + $0x98] sm:$0xf]  ;;  %v2113_v52 = vmov 1.0|1.0   ;;  %v1654_v53 = vor.u32 %v1831_v44, %v1651_v45  ;;  %v1828_v54 = vld [vmem:[#allocation7 + $0x7c] sm:$0xf] }
  0x39   :  { %v158_v21 = vand.u32 127, %v157_v8  ;;  %v1639_v55 = vld [vmem:[#allocation7 + $0x84] sm:$0xf0]  ;;  %v1791_v59 = vld [vmem:[#allocation6 + $0x10] sm:$0xf0]  ;;  %v2231_v0 = vld [vmem:[%s2370_s1] sm:$0xff] }
  0x3a   :  { %440 = vmatpush.bf16.msra.mxu2 %v1510_v13  ;;  %v1642_v57 = vor.u32 %v1828_v54, %v1639_v55  ;;  %v1489_v58 = vld [vmem:[#allocation6 + $0x8] sm:$0xf]  ;;  %v1825_v60 = vld [vmem:[#allocation7 + $0x64] sm:$0xf]  ;;  %v245_v1 = vpack.c.bf16 %v2231_v0, %v2231_v0  ;;  %v1645_v2 = vld [vmem:[#allocation7 + $0x80] sm:$0xf] }
  0x3b   :  { %237 = vmatpush.bf16.msra.mxu0 %v1781_v9  ;;  %v1506_v9 = vor.u32 %v1796_v62, %v1505_v61  ;;  %v1490_v61 = vor.u32 %v1791_v59, %v1489_v58  ;;  %v1627_v62 = vld [vmem:[#allocation7 + $0x6c] sm:$0xf0]  ;;  %v1830_v3 = vld [vmem:[#allocation7 + $0x88] sm:$0xf0]  ;;  %v1615_v6 = vld [vmem:[#allocation7 + $0x54] sm:$0xf0] }
  0x3c   :  { %v1646_v4 = vor.u32 %v1830_v3, %v1645_v2  ;;  %v1822_v5 = vld [vmem:[#allocation7 + $0x4c] sm:$0xf]  ;;  %v1633_v8 = vld [vmem:[#allocation7 + $0x68] sm:$0xf]  ;;  %v1819_v11 = vld [vmem:[#allocation7 + $0x34] sm:$0xf] }
  0x3d   :  { %427 = vmatpush.bf16.msra.mxu1 %v1506_v9  ;;  %v1618_v7 = vor.u32 %v1822_v5, %v1615_v6  ;;  %v1827_v9 = vld [vmem:[#allocation7 + $0x70] sm:$0xf0]  ;;  %v1621_v14 = vld [vmem:[#allocation7 + $0x50] sm:$0xf]  ;;  %v1824_v15 = vld [vmem:[#allocation7 + $0x58] sm:$0xf0] }
  0x3e   :  { %441 = vmatpush.bf16.msra.mxu2 %v1498_v26  ;;  %v1634_v10 = vor.u32 %v1827_v9, %v1633_v8  ;;  %v1816_v16 = vld [vmem:[#allocation7 + $0x1c] sm:$0xf]  ;;  %v1622_v17 = vor.u32 %v1824_v15, %v1621_v14  ;;  %v1591_v18 = vld [vmem:[#allocation7 + $0x24] sm:$0xf0]  ;;  %v1579_v23 = vld [vmem:[#allocation7 + $0xc] sm:$0xf0] }
  0x3f   :  { %629 = vmatpush.bf16.msrb.mxu0 %v1662_v27  ;;  %v1514_v27 = vor.u32 %v1797_v20, %v1513_v19  ;;  %v1609_v19 = vld [vmem:[#allocation7 + $0x38] sm:$0xf]  ;;  %v1821_v20 = vld [vmem:[#allocation7 + $0x40] sm:$0xf0]  ;;  %v1597_v26 = vld [vmem:[#allocation7 + $0x20] sm:$0xf] }
  0x40   :  { %v1585_v29 = vld [vmem:[#allocation7 + $0x8] sm:$0xf]  ;;  %v2241_v38 = vld [vmem:[%s2375_s6] sm:$0x7]  ;;  %v2247_v2 = vld [vmem:[#allocation2 + $0x10] sm:$0xf] }
  0x41   :  { %428 = vmatpush.bf16.msra.mxu1 %v1494_v22  ;;  %453 = vmatpush.bf16.msra.mxu3 %v1514_v27  ;;  %v1813_v22 = vld [vmem:[#allocation7 + $0x4] sm:$0xf]  ;;  %v1818_v27 = vld [vmem:[#allocation7 + $0x28] sm:$0xf0] }
  0x42   :  { %442 = vmatpush.bf16.msra.mxu2 %v1486_v46  ;;  %v1582_v25 = vor.u32 %v1813_v22, %v1579_v23  ;;  %v1598_v28 = vor.u32 %v1818_v27, %v1597_v26 }
  0x43   :  { %630 = vmatpush.bf16.msrb.mxu0 %v1650_v40  ;;  %v1666_v40 = vor.u32 %v1834_v30, %v1663_v31  ;;  %v1815_v30 = vld [vmem:[#allocation7 + $0x10] sm:$0xf0] }
  0x44   :  { %v1586_v31 = vor.u32 %v1815_v30, %v1585_v29 }
  0x45   :  { %429 = vmatpush.bf16.msra.mxu1 %v1482_v36  ;;  %454 = vmatpush.bf16.msra.mxu3 %v1502_v47 }
  0x46   :  { %655 = vmatpush.bf16.msrb.mxu2 %v1670_v48 }
  0x47   :  { %631 = vmatpush.bf16.msrb.mxu0 %v1638_v51  ;;  %v1833_v51 = vld [vmem:[#allocation7 + $0xa0] sm:$0xf0] }
  0x48   :  { %v1658_v56 = vor.u32 %v1833_v51, %v1657_v50  ;;  %v289_v50 = vperm.slane %v2241_v38, 1 }
  0x49   :  { %642 = vmatpush.bf16.msrb.mxu1 %v1666_v40  ;;  %455 = vmatpush.bf16.msra.mxu3 %v1490_v61  ;;  %v288_v40 = vperm.slane %v2241_v38, 0 }
  0x4a   :  { %656 = vmatpush.bf16.msrb.mxu2 %v1658_v56 }
  0x4b   :  { %632 = vmatpush.bf16.msrb.mxu0 %v1626_v63  ;;  %v1630_v63 = vor.u32 %v1825_v60, %v1627_v62 }
  0x4d   :  { %643 = vmatpush.bf16.msrb.mxu1 %v1654_v53 }
  0x4e   :  { %657 = vmatpush.bf16.msrb.mxu2 %v1646_v4  ;;  %v2250_v4 = vld [vmem:[#allocation2 + $0x18] sm:$0xf] }
  0x4f   :  { %633 = vmatpush.bf16.msrb.mxu0 %v1614_v12  ;;  %v1603_v12 = vld [vmem:[#allocation7 + $0x3c] sm:$0xf0] }
  0x50   :  { %v1606_v13 = vor.u32 %v1819_v11, %v1603_v12 }
  0x51   :  { %644 = vmatpush.bf16.msrb.mxu1 %v1642_v57 }
  0x52   :  { %658 = vmatpush.bf16.msrb.mxu2 %v1634_v10 }
  0x53   :  { %634 = vmatpush.bf16.msrb.mxu0 %v1602_v24  ;;  %v1610_v24 = vor.u32 %v1821_v20, %v1609_v19  ;;  %v290_v20 = vperm.slane %v2241_v38, 2 }
  0x55   :  { %645 = vmatpush.bf16.msrb.mxu1 %v1630_v63  ;;  %v246_v63 = vld [vmem:[#allocation2] sm:$0xf] }
  0x56   :  { %659 = vmatpush.bf16.msrb.mxu2 %v1622_v17  ;;  %753 = vmatpush.bf16.xpose.msrb.mxu3 %v246_v63  ;;  %v974_v6 = vsel %vm972_vm2, %v246_v63, 0 }
  0x57   :  { %635 = vmatpush.bf16.msrb.mxu0 %v1590_v37  ;;  %v493_v37 = vld [vmem:[%s2376_s7] sm:$0x7] }
  0x58   :  { %v495_v39 = vperm.slane %v493_v37, 0  ;;  %v496_v51 = vperm.slane %v493_v37, 1  ;;  %v497_v9 = vperm.slane %v493_v37, 2 }
  0x59   :  { %646 = vmatpush.bf16.msrb.mxu1 %v1618_v7 }
  0x5a   :  { %660 = vmatpush.bf16.msrb.mxu2 %v1610_v24 }
  0x5b   :  { %636 = vmatpush.bf16.msrb.mxu0 %v1578_v49 }
  0x5d   :  { %647 = vmatpush.bf16.msrb.mxu1 %v1606_v13 }
  0x5e   :  { %661 = vmatpush.bf16.msrb.mxu2 %v1598_v28 }
  0x62   :  { %662 = vmatpush.bf16.msrb.mxu2 %v1586_v31 }
  0x92   :  { %v161_v43 = vpop.permute.xlu0 %160 }
  0x93   :  { %vm162_vm0 = vcmp.eq.s32.totalorder %v158_v21, %v161_v43  ;;  %v1594_v21 = vor.u32 %v1816_v16, %v1591_v18  ;;  %v2255_v18 = vld [vmem:[#allocation2 + $0x4] sm:$0xf] }
  0x94   :  { %vm1477_vm1 = vmpackc.low %vm162_vm0, %vm162_vm0  ;;  %vm968_vm0 = vcmask 64512  }
  0x95   :  { %1478 = vmatmul.msk.bf16.vlgmr.msra.gmra.mxu0 %vm1477_vm1, %v2113_v52  ;;  %648 = vmatpush.bf16.msrb.mxu1 %v1594_v21  ;;  %v2259_v21 = vld [vmem:[#allocation2 + $0xc] sm:$0xf]  ;;  %vm1185_vm1 = vcmask 1044484  }
  0x96   :  { %849 = vmatpush.bf16.xpose.msra.mxu0 %v2250_v4 }
  0x99   :  { %649 = vmatpush.bf16.msrb.mxu1 %v1582_v25 }
  0xa5   :  { %637 = vmatmul.bf16.vlgmr.msrb.gmra.mxu0 %v245_v1 }
 0x112   :  { %v239_v32 = vpop.f32.mrf.mxu0 }
 0x113   :  { %v243_v33 = vpack.c.bf16 %v239_v32, %v239_v32 }
 0x115   :  { %430 = vmatmul.bf16.vlgmr.msra.gmra.mxu1 %v243_v33  ;;  %443 = vmatmul.bf16.vlgmr.msra.gmra.mxu2 %v243_v33 }
 0x116   :  { %456 = vmatmul.bf16.vlgmr.msra.gmra.mxu3 %v243_v33  ;;  %817 = vmatpush.bf16.xpose.msra.mxu2 %v2247_v2 }
 0x117   :  { %769 = vmatpush.bf16.xpose.msra.mxu3 %v2255_v18 }
 0x11a   :  { %v241_v34 = vpop.f32.mrf.mxu0 }
 0x122   :  { %v638_v35 = vpop.f32.mrf.mxu0 }
 0x123   :  { %v639_v41 = vadd.f32 %v638_v35, %v495_v39 }
 0x125   :  { %650 = vmatmul.bf16.vlgmr.msrb.gmra.mxu1 %v245_v1  ;;  %663 = vmatmul.bf16.vlgmr.msrb.gmra.mxu2 %v245_v1  ;;  %v2245_v1 = vld [vmem:[#allocation2 + $0x8] sm:$0xf] }
 0x126   :  { %785 = vmatpush.bf16.xpose.msra.mxu1 %v2245_v1  ;;  %983 = vmatpush.bf16.msrb.mxu2 %v974_v6 }
 0x12a   :  { %v640_v36 = vpop.f32.mrf.mxu0 }
 0x12e   :  { %801 = vmatpush.bf16.xpose.msrb.mxu1 %v2259_v21 }
 0x192   :  { %v431_v42 = vpop.f32.mrf.mxu1 }
 0x193   :  { %v432_v43 = vadd.f32 %v431_v42, %v288_v40 }
 0x195   :  { %v668_v44 = vadd.f32 %v639_v41, %v432_v43 }
 0x197   :  { %v1671_v45 = vmul.f32 -1.442695, %v668_v44 }
 0x198   :  { %v444_v46 = vpop.f32.mrf.mxu2 }
 0x199   :  { %1877 = vpow2.f32 %v1671_v45  ;;  %v457_v47 = vpop.f32.mrf.mxu3  ;;  %v445_v56 = vadd.f32 %v444_v46, %v289_v50 }
 0x19a   :  { %v433_v48 = vpop.f32.mrf.mxu1  ;;  %v458_v24 = vadd.f32 %v457_v47, %v290_v20 }
 0x19f   :  { %v1878_v49 = vpop.eup %1877 }
 0x1a0   :  { %v672_v52 = vadd.f32 1.0, %v1878_v49  ;;  %v446_v53 = vpop.f32.mrf.mxu2 }
 0x1a1   :  { %v459_v54 = vpop.f32.mrf.mxu3 }
 0x1a2   :  { %1879 = vrcp.f32 %v672_v52  ;;  %v651_v55 = vpop.f32.mrf.mxu1  ;;  %v684_v8 = vand.u32 2147483648, %v672_v52  ;;  %v682_v10 = vand.u32 2147483647, %v672_v52  ;;  %vm678_vm4 = vweird.f32 %v672_v52 }
 0x1a3   :  { %v652_v57 = vadd.f32 %v651_v55, %v496_v51 }
 0x1a4   :  { %v685_v16 = vor.u32 1.1754944e-38, %v684_v8  ;;  %vm683_vm6 = vcmp.eq.f32.partialorder %v682_v10, 8.507059e+37 }
 0x1a5   :  { %v688_v58 = vadd.f32 %v652_v57, %v445_v56  ;;  %v2278_v56 = vld [vmem:[#allocation2 + $0x1c] sm:$0xf] }
 0x1a7   :  { %v1672_v59 = vmul.f32 -1.442695, %v688_v58 }
 0x1a8   :  { %v1880_v60 = vpop.eup %1879  ;;  %v664_v61 = vpop.f32.mrf.mxu2 }
 0x1a9   :  { %1881 = vpow2.f32 %v1672_v59  ;;  %v674_v62 = vmul.f32 %v1880_v60, %v672_v52  ;;  %vm679_vm3 = vweird.f32 %v1880_v60  ;;  %v665_v17 = vadd.f32 %v664_v61, %v497_v9  ;;  %v2276_v52 = vld [vmem:[#allocation2 + $0x14] sm:$0xf] }
 0x1aa   :  { %v653_v3 = vpop.f32.mrf.mxu1  ;;  %vm680_vm5 = vmor %vm678_vm4, %vm679_vm3  ;;  %vm1191_vm3 = vcmask 1046534   ;;  %vm1194_vm4 = vcmask 1047559  }
 0x1ab   :  { %v675_v5 = vsub.f32 1.0, %v674_v62 }
 0x1ad   :  { %v676_v7 = vmul.f32 %v1880_v60, %v675_v5 }
 0x1af   :  { %v1882_v11 = vpop.eup %1881  ;;  %v677_v12 = vadd.f32 %v1880_v60, %v676_v7 }
 0x1b0   :  { %v692_v13 = vadd.f32 1.0, %v1882_v11  ;;  %v666_v14 = vpop.f32.mrf.mxu2 }
 0x1b1   :  { %v681_v15 = vsel %vm680_vm5, %v1880_v60, %v677_v12 }
 0x1b2   :  { %1883 = vrcp.f32 %v692_v13  ;;  %v686_v19 = vsel %vm683_vm6, %v685_v16, %v681_v15  ;;  %v704_v28 = vand.u32 2147483648, %v692_v13  ;;  %v702_v30 = vand.u32 2147483647, %v692_v13 }
 0x1b3   :  { %v708_v22 = vmul.f32 %v686_v19, %v665_v17  ;;  %vm698_vm8 = vweird.f32 %v692_v13 }
 0x1b4   :  { %v705_v32 = vor.u32 1.1754944e-38, %v704_v28  ;;  %vm703_vm10 = vcmp.eq.f32.partialorder %v702_v30, 8.507059e+37 }
 0x1b5   :  { %v709_v26 = vadd.f32 %v708_v22, %v458_v24 }
 0x1b7   :  { %1885 = vtanh.f32 %v709_v26 }
 0x1b8   :  { %v1884_v23 = vpop.eup %1883 }
 0x1b9   :  { %v694_v25 = vmul.f32 %v1884_v23, %v692_v13  ;;  %vm699_vm7 = vweird.f32 %v1884_v23 }
 0x1ba   :  { %vm700_vm9 = vmor %vm698_vm8, %vm699_vm7 }
 0x1bb   :  { %v695_v27 = vsub.f32 1.0, %v694_v25 }
 0x1bd   :  { %v696_v29 = vmul.f32 %v1884_v23, %v695_v27  ;;  %v1886_v36 = vpop.eup %1885 }
 0x1bf   :  { %v697_v31 = vadd.f32 %v1884_v23, %v696_v29 }
 0x1c1   :  { %v701_v33 = vsel %vm700_vm9, %v1884_v23, %v697_v31 }
 0x1c2   :  { %v706_v34 = vsel %vm703_vm10, %v705_v32, %v701_v33 }
 0x1c3   :  { %v711_v35 = vsub.f32 1.0, %v706_v34  ;;  %v713_v38 = vmul.f32 %v706_v34, %v2231_v0 }
 0x1c5   :  { %v712_v37 = vmul.f32 %v1886_v36, %v711_v35 }
 0x1c7   :  { %v714_v39 = vadd.f32 %v713_v38, %v712_v37 }
 0x1c9   :  { %v2263_v40 = vpack.c.bf16 %v714_v39, %v714_v39  ;;  %1431 = vst [vmem:[%s2383_s14] sm:$0xff] %v714_v39 }
 0x1cb   :  { %v717_v41 = vrot.slane %v2263_v40, 3 }
 0x1cd   :  { %v721_v42 = vsel %vm718_vm11, %v2263_v40, %v717_v41  ;;  %v724_v43 = vsel %vm723_vm12, %v2263_v40, %v717_v41  ;;  %v728_v0 = vsel %vm727_vm13, %v2263_v40, %v717_v41  ;;  %v732_v44 = vsel %vm731_vm14, %v2263_v40, %v717_v41 }
 0x1ce   :  { %v1673_v45 = vpack.i.b16 %v721_v42, %v721_v42  ;;  %v726_v46 = vrot.slane %v724_v43, 1  ;;  %v730_v47 = vrot.slane %v728_v0, 2  ;;  %v734_v48 = vrot.slane %v732_v44, 3 }
 0x1cf   :  { %v736_v58 = vunpack.i.h.s16 %v721_v42 }
 0x1d0   :  { %v744_v49 = vperm.slane %v1673_v45, 0  ;;  %v1674_v50 = vpack.i.b16 %v726_v46, %v726_v46  ;;  %v1675_v51 = vpack.i.b16 %v730_v47, %v730_v47  ;;  %v1676_v53 = vpack.i.b16 %v734_v48, %v734_v48 }
 0x1d1   :  { %v738_v59 = vunpack.i.h.s16 %v726_v46  ;;  %v759_v60 = vpack.i.b16 %v736_v58, %v736_v58  ;;  %v740_v3 = vunpack.i.h.s16 %v730_v47  ;;  %v742_v5 = vunpack.i.h.s16 %v734_v48 }
 0x1d2   :  { %754 = vmatmul.bf16.vlgmr.msrb.gmra.mxu3 %v744_v49  ;;  %v776_v54 = vperm.slane %v1674_v50, 0  ;;  %v808_v55 = vperm.slane %v1675_v51, 0  ;;  %v840_v57 = vperm.slane %v1676_v53, 0 }
 0x1d3   :  { %833 = vmatpush.bf16.xpose.msrb.mxu3 %v2276_v52  ;;  %v791_v61 = vpack.i.b16 %v738_v59, %v738_v59  ;;  %v760_v62 = vperm.slane %v759_v60, 0  ;;  %v823_v6 = vpack.i.b16 %v740_v3, %v740_v3  ;;  %v855_v7 = vpack.i.b16 %v742_v5, %v742_v5 }
 0x1d4   :  { %786 = vmatmul.bf16.vlgmr.msra.gmra.mxu1 %v776_v54  ;;  %818 = vmatmul.bf16.vlgmr.msra.gmra.mxu2 %v808_v55 }
 0x1d5   :  { %850 = vmatmul.bf16.vlgmr.msra.gmra.mxu0 %v840_v57  ;;  %865 = vmatpush.bf16.xpose.msra.mxu1 %v2278_v56  ;;  %v792_v63 = vperm.slane %v791_v61, 0  ;;  %v824_v8 = vperm.slane %v823_v6, 0  ;;  %v856_v9 = vperm.slane %v855_v7, 0 }
 0x1e2   :  { %770 = vmatmul.bf16.vlgmr.msra.gmra.mxu3 %v760_v62 }
 0x1e4   :  { %802 = vmatmul.bf16.vlgmr.msrb.gmra.mxu1 %v792_v63 }
 0x1f2   :  { %834 = vmatmul.bf16.vlgmr.msrb.gmra.mxu3 %v824_v8 }
 0x1f4   :  { %866 = vmatmul.bf16.vlgmr.msra.gmra.mxu1 %v856_v9 }
 0x251   :  { %v787_v10 = vpop.f32.mrf.mxu1 }
 0x252   :  { %v2282_v11 = vpop.f32.mrf.mxu0  ;;  %v878_v28 = vsel %vm871_vm15, %v787_v10, -inf }
 0x253   :  { %v890_v30 = vsel %vm871_vm15, %v2282_v11, -inf }
 0x255   :  { %v755_v12 = vpop.f32.mrf.mxu3 }
 0x256   :  { %v872_v13 = vsel %vm871_vm15, %v755_v12, -inf }
 0x257   :  { %v819_v14 = vpop.f32.mrf.mxu2  ;;  %873 = vmax.xlane.f32.xlu0 %v872_v13 }
 0x258   :  { %v884_v26 = vsel %vm871_vm15, %v819_v14, -inf }
 0x259   :  { %v789_v15 = vpop.f32.mrf.mxu1 }
 0x25a   :  { %v853_v16 = vpop.f32.mrf.mxu0 }
 0x25d   :  { %v757_v17 = vpop.f32.mrf.mxu3 }
 0x25f   :  { %v821_v19 = vpop.f32.mrf.mxu2 }
 0x260   :  { %v993_v19 = vsel %vm972_vm2, %v2255_v18, 0 }
 0x261   :  { %v803_v20 = vpop.f32.mrf.mxu1  ;;  %1002 = vmatpush.bf16.msra.mxu3 %v993_v19  ;;  %v1860_v19 = vld [vmem:[#allocation12 + $0x38] sm:$0xff] }
 0x262   :  { %v881_v22 = vsel %vm871_vm15, %v803_v20, -inf }
 0x263   :  { %882 = vmax.xlane.f32.xlu2 %v881_v22  ;;  %v1031_v22 = vsel %vm972_vm2, %v2259_v21, 0  ;;  %v1088_v21 = vsel %vm972_vm2, %v2250_v4, 0  ;;  %v1843_v4 = vld [vmem:[#allocation9 + $0x30] sm:$0xff] }
 0x264   :  { %1040 = vmatpush.bf16.msrb.mxu1 %v1031_v22 }
 0x265   :  { %v771_v23 = vpop.f32.mrf.mxu3 }
 0x266   :  { %v875_v24 = vsel %vm871_vm15, %v771_v23, -inf }
 0x267   :  { %876 = vmax.xlane.f32.xlu1 %v875_v24 }
 0x269   :  { %v805_v25 = vpop.f32.mrf.mxu1 }
 0x26a   :  { %v1050_v25 = vsel %vm972_vm2, %v2247_v2, 0 }
 0x26b   :  { %885 = vmax.xlane.f32.xlu2 %v884_v26  ;;  %1059 = vmatpush.bf16.msra.mxu2 %v1050_v25 }
 0x26d   :  { %v773_v27 = vpop.f32.mrf.mxu3 }
 0x26e   :  { %v1107_v27 = vsel %vm972_vm2, %v2278_v56, 0 }
 0x26f   :  { %879 = vmax.xlane.f32.xlu1 %v878_v28  ;;  %1116 = vmatpush.bf16.msra.mxu1 %v1107_v27 }
 0x271   :  { %v867_v29 = vpop.f32.mrf.mxu1 }
 0x272   :  { %v893_v35 = vsel %vm871_vm15, %v867_v29, -inf }
 0x273   :  { %891 = vmax.xlane.f32.xlu2 %v890_v30 }
 0x275   :  { %v835_v31 = vpop.f32.mrf.mxu3 }
 0x276   :  { %v887_v32 = vsel %vm871_vm15, %v835_v31, -inf }
 0x277   :  { %888 = vmax.xlane.f32.xlu1 %v887_v32 }
 0x279   :  { %v869_v33 = vpop.f32.mrf.mxu1 }
 0x27d   :  { %v837_v34 = vpop.f32.mrf.mxu3 }
 0x27f   :  { %894 = vmax.xlane.f32.xlu1 %v893_v35 }
 0x2ca   :  { %v874_v36 = vpop.xlane.xlu0 %873 }
 0x2cb   :  { %v896_v37 = vsub.f32 %v755_v12, %v874_v36 }
 0x2cd   :  { %v904_v38 = vmul.f32 1.442695, %v896_v37 }
 0x2cf   :  { %1887 = vpow2.f32 %v904_v38  ;;  %v1842_v38 = vld [vmem:[#allocation9 + $0x28] sm:$0xff] }
 0x2d5   :  { %v2293_v39 = vpop.eup %1887 }
 0x2d6   :  { %v883_v41 = vpop.xlane.xlu2 %882  ;;  %v920_v42 = vsel %vm871_vm15, %v2293_v39, 0.0 }
 0x2d7   :  { %921 = vadd.xlane.f32.xlu2 %v920_v42  ;;  %v899_v44 = vsub.f32 %v803_v20, %v883_v41  ;;  %v1012_v20 = vsel %vm972_vm2, %v2245_v1, 0  ;;  %v1841_v42 = vld [vmem:[#allocation9 + $0x20] sm:$0xff] }
 0x2d8   :  { %1021 = vmatpush.bf16.msrb.mxu0 %v1012_v20 }
 0x2d9   :  { %v910_v47 = vmul.f32 1.442695, %v899_v44 }
 0x2da   :  { %v877_v43 = vpop.xlane.xlu1 %876 }
 0x2db   :  { %v897_v0 = vsub.f32 %v771_v23, %v877_v43  ;;  %v1069_v23 = vsel %vm972_vm2, %v2276_v52, 0  ;;  %vm1188_vm2 = vcmask 1045509  }
 0x2dc   :  { %1078 = vmatpush.bf16.msrb.mxu3 %v1069_v23  ;;  %1097 = vmatpush.bf16.msra.mxu0 %v1088_v21 }
 0x2dd   :  { %v906_v45 = vmul.f32 1.442695, %v897_v0 }
 0x2de   :  { %v886_v46 = vpop.xlane.xlu2 %885 }
 0x2df   :  { %1889 = vpow2.f32 %v906_v45  ;;  %v900_v51 = vsub.f32 %v819_v14, %v886_v46 }
 0x2e0   :  { %1891 = vpow2.f32 %v910_v47 }
 0x2e1   :  { %v912_v55 = vmul.f32 1.442695, %v900_v51  ;;  %v1839_v51 = vld [vmem:[#allocation9 + $0x10] sm:$0xff] }
 0x2e2   :  { %v880_v48 = vpop.xlane.xlu1 %879 }
 0x2e3   :  { %v898_v49 = vsub.f32 %v787_v10, %v880_v48 }
 0x2e5   :  { %v2297_v50 = vpop.eup %1889  ;;  %v908_v53 = vmul.f32 1.442695, %v898_v49  ;;  %v1840_v49 = vld [vmem:[#allocation9 + $0x18] sm:$0xff] }
 0x2e6   :  { %v923_v54 = vsel %vm871_vm15, %v2297_v50, 0.0  ;;  %v892_v57 = vpop.xlane.xlu2 %891  ;;  %v2301_v59 = vpop.eup %1891 }
 0x2e7   :  { %1893 = vpow2.f32 %v908_v53  ;;  %924 = vadd.xlane.f32.xlu1 %v923_v54  ;;  %v902_v62 = vsub.f32 %v2282_v11, %v892_v57  ;;  %v929_v5 = vsel %vm871_vm15, %v2301_v59, 0.0 }
 0x2e8   :  { %1895 = vpow2.f32 %v912_v55 }
 0x2e9   :  { %v916_v6 = vmul.f32 1.442695, %v902_v62  ;;  %v1852_v62 = vld [vmem:[#allocation10 + $0x38] sm:$0xff] }
 0x2ea   :  { %v889_v58 = vpop.xlane.xlu1 %888 }
 0x2eb   :  { %v901_v60 = vsub.f32 %v835_v31, %v889_v58  ;;  %v1844_v31 = vld [vmem:[#allocation9 + $0x38] sm:$0xff] }
 0x2ed   :  { %v2303_v61 = vpop.eup %1893  ;;  %v914_v63 = vmul.f32 1.442695, %v901_v60 }
 0x2ee   :  { %v926_v3 = vsel %vm871_vm15, %v2303_v61, 0.0  ;;  %v2310_v8 = vpop.eup %1895 }
 0x2ef   :  { %1897 = vpow2.f32 %v914_v63  ;;  %927 = vadd.xlane.f32.xlu2 %v926_v3  ;;  %930 = vadd.xlane.f32.xlu1 %v929_v5  ;;  %v932_v11 = vsel %vm871_vm15, %v2310_v8, 0.0  ;;  %v1851_v63 = vld [vmem:[#allocation10 + $0x30] sm:$0xff]  ;;  %v1850_v3 = vld [vmem:[#allocation10 + $0x28] sm:$0xff]  ;;  %v1849_v5 = vld [vmem:[#allocation10 + $0x20] sm:$0xff] }
 0x2f0   :  { %1899 = vpow2.f32 %v916_v6  ;;  %v1848_v6 = vld [vmem:[#allocation10 + $0x18] sm:$0xff] }
 0x2f2   :  { %v895_v7 = vpop.xlane.xlu1 %894 }
 0x2f3   :  { %v903_v9 = vsub.f32 %v867_v29, %v895_v7 }
 0x2f5   :  { %v2312_v10 = vpop.eup %1897  ;;  %v918_v12 = vmul.f32 1.442695, %v903_v9  ;;  %v1846_v9 = vld [vmem:[#allocation10 + $0x8] sm:$0xff] }
 0x2f6   :  { %v935_v13 = vsel %vm871_vm15, %v2312_v10, 0.0  ;;  %v2318_v14 = vpop.eup %1899 }
 0x2f7   :  { %1901 = vpow2.f32 %v918_v12  ;;  %933 = vadd.xlane.f32.xlu2 %v932_v11  ;;  %936 = vadd.xlane.f32.xlu1 %v935_v13  ;;  %v938_v16 = vsel %vm871_vm15, %v2318_v14, 0.0  ;;  %v1845_v12 = vld [vmem:[#allocation10] sm:$0xff] }
 0x2fd   :  { %v2320_v15 = vpop.eup %1901 }
 0x2fe   :  { %v941_v17 = vsel %vm871_vm15, %v2320_v15, 0.0 }
 0x2ff   :  { %939 = vadd.xlane.f32.xlu2 %v938_v16  ;;  %942 = vadd.xlane.f32.xlu0 %v941_v17 }
 0x34a   :  { %v922_v24 = vpop.xlane.xlu2 %921 }
 0x34b   :  { %1903 = vrcp.f32 %v922_v24 }
 0x351   :  { %v1904_v18 = vpop.eup %1903 }
 0x352   :  { %v952_v26 = vmul.f32 %v1904_v18, %v2293_v39  ;;  %v1859_v18 = vld [vmem:[#allocation12 + $0x30] sm:$0xff] }
 0x354   :  { %v960_v1 = vpack.c.bf16 %v952_v26, %v952_v26 }
 0x356   :  { %1677 = vmatmul.msk.bf16.vlgmr.msrb.gmra.mxu2 %vm968_vm0, %v960_v1 }
 0x357   :  { %1246 = vmatpush.bf16.msrb.mxu2 %v1852_v62  ;;  %v1853_v62 = vld [vmem:[#allocation12] sm:$0xff] }
 0x35a   :  { %v925_v52 = vpop.xlane.xlu1 %924 }
 0x35b   :  { %1905 = vrcp.f32 %v925_v52  ;;  %1247 = vmatpush.bf16.msrb.mxu2 %v1851_v63  ;;  %v1858_v52 = vld [vmem:[#allocation12 + $0x28] sm:$0xff]  ;;  %v1875_v63 = vld [vmem:[%s2379_s10] ss:$0 sm:$0xff] }
 0x35f   :  { %1248 = vmatpush.bf16.msrb.mxu2 %v1850_v3 }
 0x361   :  { %v1906_v28 = vpop.eup %1905 }
 0x362   :  { %v953_v2 = vmul.f32 %v1906_v28, %v2297_v50  ;;  %v928_v29 = vpop.xlane.xlu2 %927  ;;  %v931_v30 = vpop.xlane.xlu1 %930 }
 0x363   :  { %1907 = vrcp.f32 %v928_v29  ;;  %1249 = vmatpush.bf16.msrb.mxu2 %v1849_v5 }
 0x364   :  { %v961_v32 = vpack.c.bf16 %v953_v2, %v953_v2  ;;  %1909 = vrcp.f32 %v931_v30 }
 0x366   :  { %1678 = vmatmul.msk.bf16.vlgmr.msra.gmra.mxu3 %vm968_vm0, %v961_v32 }
 0x367   :  { %1307 = vmatpush.bf16.msra.mxu3 %v1844_v31  ;;  %1250 = vmatpush.bf16.msrb.mxu2 %v1848_v6 }
 0x369   :  { %v1908_v56 = vpop.eup %1907 }
 0x36a   :  { %v1910_v33 = vpop.eup %1909  ;;  %v954_v34 = vmul.f32 %v1908_v56, %v2303_v61  ;;  %v934_v35 = vpop.xlane.xlu2 %933  ;;  %v1837_v61 = vld [vmem:[#allocation9] sm:$0xff] }
 0x36b   :  { %v937_v36 = vpop.xlane.xlu1 %936  ;;  %v955_v37 = vmul.f32 %v1910_v33, %v2301_v59  ;;  %1911 = vrcp.f32 %v934_v35  ;;  %1308 = vmatpush.bf16.msra.mxu3 %v1843_v4  ;;  %v1838_v59 = vld [vmem:[#allocation9 + $0x8] sm:$0xff] }
 0x36c   :  { %v962_v39 = vpack.c.bf16 %v954_v34, %v954_v34  ;;  %1913 = vrcp.f32 %v937_v36  ;;  %v1857_v36 = vld [vmem:[#allocation12 + $0x20] sm:$0xff] }
 0x36d   :  { %v963_v41 = vpack.c.bf16 %v955_v37, %v955_v37 }
 0x36e   :  { %1679 = vmatmul.msk.bf16.vlgmr.msrb.gmra.mxu0 %vm968_vm0, %v962_v39 }
 0x36f   :  { %1680 = vmatmul.msk.bf16.vlgmr.msrb.gmra.mxu1 %vm968_vm0, %v963_v41  ;;  %1309 = vmatpush.bf16.msra.mxu3 %v1842_v38 }
 0x370   :  { %1395 = vmatpush.bf16.msrb.mxu0 %v1860_v19 }
 0x371   :  { %v1912_v43 = vpop.eup %1911 }
 0x372   :  { %v1914_v0 = vpop.eup %1913  ;;  %v956_v44 = vmul.f32 %v1912_v43, %v2310_v8  ;;  %v940_v45 = vpop.xlane.xlu2 %939  ;;  %v1847_v8 = vld [vmem:[#allocation10 + $0x10] sm:$0xff] }
 0x373   :  { %v943_v46 = vpop.xlane.xlu0 %942  ;;  %v957_v47 = vmul.f32 %v1914_v0, %v2312_v10  ;;  %1915 = vrcp.f32 %v940_v45  ;;  %1310 = vmatpush.bf16.msra.mxu3 %v1841_v42  ;;  %1251 = vmatpush.bf16.msrb.mxu2 %v1847_v8 }
 0x374   :  { %v964_v48 = vpack.c.bf16 %v956_v44, %v956_v44  ;;  %1917 = vrcp.f32 %v943_v46  ;;  %1396 = vmatpush.bf16.msrb.mxu0 %v1859_v18  ;;  %v1856_v46 = vld [vmem:[#allocation12 + $0x18] sm:$0xff] }
 0x375   :  { %v965_v50 = vpack.c.bf16 %v957_v47, %v957_v47 }
 0x376   :  { %1681 = vmatmul.msk.bf16.vlgmr.msra.gmra.mxu2 %vm968_vm0, %v964_v48 }
 0x377   :  { %1682 = vmatmul.msk.bf16.vlgmr.msrb.gmra.mxu3 %vm968_vm0, %v965_v50  ;;  %1252 = vmatpush.bf16.msrb.mxu2 %v1846_v9 }
 0x378   :  { %1311 = vmatpush.bf16.msra.mxu3 %v1840_v49  ;;  %1397 = vmatpush.bf16.msrb.mxu0 %v1858_v52 }
 0x379   :  { %v1916_v53 = vpop.eup %1915 }
 0x37a   :  { %v1918_v54 = vpop.eup %1917  ;;  %v958_v55 = vmul.f32 %v1916_v53, %v2318_v14 }
 0x37b   :  { %v959_v57 = vmul.f32 %v1918_v54, %v2320_v15  ;;  %1253 = vmatpush.bf16.msrb.mxu2 %v1845_v12 }
 0x37c   :  { %v966_v58 = vpack.c.bf16 %v958_v55, %v958_v55  ;;  %1312 = vmatpush.bf16.msra.mxu3 %v1839_v51  ;;  %1398 = vmatpush.bf16.msrb.mxu0 %v1857_v36 }
 0x37d   :  { %v967_v60 = vpack.c.bf16 %v959_v57, %v959_v57 }
 0x37e   :  { %1683 = vmatmul.msk.bf16.vlgmr.msra.gmra.mxu0 %vm968_vm0, %v966_v58 }
 0x37f   :  { %1684 = vmatmul.msk.bf16.vlgmr.msra.gmra.mxu1 %vm968_vm0, %v967_v60  ;;  %v1855_v60 = vld [vmem:[#allocation12 + $0x10] sm:$0xff] }
 0x380   :  { %1313 = vmatpush.bf16.msra.mxu3 %v1838_v59  ;;  %1399 = vmatpush.bf16.msrb.mxu0 %v1856_v46 }
 0x384   :  { %1314 = vmatpush.bf16.msra.mxu3 %v1837_v61  ;;  %1400 = vmatpush.bf16.msrb.mxu0 %v1855_v60  ;;  %v1854_v61 = vld [vmem:[#allocation12 + $0x8] sm:$0xff] }
 0x387   :  { %1315 = vmatmul.bf16.vlgmr.msra.gmra.mxu3 %v2263_v40 }
 0x388   :  { %1401 = vmatpush.bf16.msrb.mxu0 %v1854_v61 }
 0x38c   :  { %1402 = vmatpush.bf16.msrb.mxu0 %v1853_v62 }
 0x3d9   :  { %v985_v7 = vpop.f32.mrf.mxu2 }
 0x3da   :  { %v1138_v20 = vpack.c.bf16 %v985_v7, %v985_v7 }
 0x3dc   :  { %v1170_v1 = vunpack.c.l.b16 %v1138_v20 }
 0x3e1   :  { %v987_v10 = vpop.f32.mrf.mxu2 }
 0x3e2   :  { %v1876_v10 = vld [vmem:[%s2381_s12] ss:$0 sm:$0xff] }
 0x3e9   :  { %v1004_v11 = vpop.f32.mrf.mxu3 }
 0x3ea   :  { %v1139_v14 = vpack.c.bf16 %v1004_v11, %v1004_v11 }
 0x3eb   :  { %v1023_v40 = vpop.f32.mrf.mxu0 }
 0x3ec   :  { %v1042_v13 = vpop.f32.mrf.mxu1  ;;  %v1140_v15 = vpack.c.bf16 %v1023_v40, %v1023_v40  ;;  %v1171_v16 = vunpack.c.l.b16 %v1139_v14 }
 0x3ed   :  { %v1141_v22 = vpack.c.bf16 %v1042_v13, %v1042_v13 }
 0x3ee   :  { %v1172_v24 = vunpack.c.l.b16 %v1140_v15  ;;  %v1178_v26 = vrot.slane %v1171_v16, 7 }
 0x3ef   :  { %v1173_v21 = vunpack.c.l.b16 %v1141_v22 }
 0x3f0   :  { %v1180_v27 = vrot.slane %v1172_v24, 6  ;;  %v1179_v28 = vsel %vm723_vm12, %v1178_v26, %v1170_v1 }
 0x3f1   :  { %v1006_v17 = vpop.f32.mrf.mxu3  ;;  %v1182_v31 = vrot.slane %v1173_v21, 5 }
 0x3f2   :  { %v1181_v56 = vsel %vm727_vm13, %v1180_v27, %v1179_v28 }
 0x3f3   :  { %v1025_v23 = vpop.f32.mrf.mxu0  ;;  %v1183_v42 = vsel %vm731_vm14, %v1182_v31, %v1181_v56 }
 0x3f4   :  { %v1044_v25 = vpop.f32.mrf.mxu1 }
 0x3f9   :  { %v1061_v2 = vpop.f32.mrf.mxu2 }
 0x3fa   :  { %v1142_v29 = vpack.c.bf16 %v1061_v2, %v1061_v2  ;;  %v1080_v30 = vpop.f32.mrf.mxu3 }
 0x3fb   :  { %v1143_v32 = vpack.c.bf16 %v1080_v30, %v1080_v30  ;;  %v1099_v4 = vpop.f32.mrf.mxu0 }
 0x3fc   :  { %v1174_v33 = vunpack.c.l.b16 %v1142_v29  ;;  %v1144_v34 = vpack.c.bf16 %v1099_v4, %v1099_v4  ;;  %v1118_v35 = vpop.f32.mrf.mxu1 }
 0x3fd   :  { %v1175_v37 = vunpack.c.l.b16 %v1143_v32  ;;  %v1145_v38 = vpack.c.bf16 %v1118_v35, %v1118_v35 }
 0x3fe   :  { %v1184_v39 = vrot.slane %v1174_v33, 4  ;;  %v1176_v41 = vunpack.c.l.b16 %v1144_v34 }
 0x3ff   :  { %v1187_v43 = vrot.slane %v1175_v37, 3  ;;  %v1177_v0 = vunpack.c.l.b16 %v1145_v38 }
 0x400   :  { %v1186_v44 = vsel %vm1185_vm1, %v1184_v39, %v1183_v42  ;;  %v1190_v45 = vrot.slane %v1176_v41, 2 }
 0x401   :  { %v1189_v47 = vsel %vm1188_vm2, %v1187_v43, %v1186_v44  ;;  %v1193_v48 = vrot.slane %v1177_v0, 1  ;;  %v1063_v49 = vpop.f32.mrf.mxu2 }
 0x402   :  { %v1192_v50 = vsel %vm1191_vm3, %v1190_v45, %v1189_v47  ;;  %v1082_v51 = vpop.f32.mrf.mxu3 }
 0x403   :  { %v1195_v53 = vsel %vm1194_vm4, %v1193_v48, %v1192_v50  ;;  %v1101_v54 = vpop.f32.mrf.mxu0 }
 0x404   :  { %v1196_v55 = vpack.c.b16 %v1195_v53, %v1195_v53  ;;  %v1120_v57 = vpop.f32.mrf.mxu1 }
 0x406   :  { %1254 = vmatmul.bf16.vlgmr.msrb.gmra.mxu2 %v1196_v55 }
 0x40a   :  { %v1316_v58 = vpop.f32.mrf.mxu3 }
 0x412   :  { %v1318_v59 = vpop.f32.mrf.mxu3 }
 0x489   :  { %v1255_v3 = vpop.f32.mrf.mxu2 }
 0x48a   :  { %v1317_v5 = vadd.f32 %v1316_v58, %v1255_v3 }
 0x48c   :  { %v1324_v6 = vadd.f32 %v1875_v63, %v1317_v5 }
 0x48e   :  { %1919 = vtanh.f32 %v1324_v6 }
 0x491   :  { %v1257_v7 = vpop.f32.mrf.mxu2 }
 0x494   :  { %v1920_v8 = vpop.eup %1919 }
 0x495   :  { %v1326_v9 = vpack.c.bf16 %v1920_v8, %v1920_v8 }
 0x497   :  { %1403 = vmatmul.bf16.vlgmr.msrb.gmra.mxu0 %v1326_v9 }
 0x514   :  { %v1404_v12 = vpop.f32.mrf.mxu0 }
 0x515   :  { %v1405_v11 = vadd.f32 %v1876_v10, %v1404_v12 }
 0x517   :  { %1408 = vmax.xlane.f32.xlu1 %v1405_v11 }
 0x51c   :  { %v1406_v40 = vpop.f32.mrf.mxu0 }
 0x58a   :  { %v1409_v13 = vpop.xlane.xlu1 %1408 }
 0x58b   :  { %v1410_v14 = vsub.f32 %v1405_v11, %v1409_v13 }
 0x58d   :  { %v1411_v15 = vmul.f32 1.442695, %v1410_v14 }
 0x58f   :  { %1921 = vpow2.f32 %v1411_v15 }
 0x595   :  { %v1922_v16 = vpop.eup %1921 }
 0x596   :  { %1413 = vadd.xlane.f32.xlu2 %v1922_v16 }
 0x609   :  { %v1414_v17 = vpop.xlane.xlu2 %1413 }
 0x60a   :  { %1923 = vrcp.f32 %v1414_v17  ;;  %v1426_v23 = vand.u32 2147483648, %v1414_v17  ;;  %v1424_v25 = vand.u32 2147483647, %v1414_v17  ;;  %vm1420_vm6 = vweird.f32 %v1414_v17 }
 0x60c   :  { %v1427_v26 = vor.u32 1.1754944e-38, %v1426_v23  ;;  %vm1425_vm8 = vcmp.eq.f32.partialorder %v1424_v25, 8.507059e+37 }
 0x610   :  { %v1924_v19 = vpop.eup %1923 }
 0x611   :  { %v1416_v20 = vmul.f32 %v1924_v19, %v1414_v17  ;;  %vm1421_vm5 = vweird.f32 %v1924_v19 }
 0x612   :  { %vm1422_vm7 = vmor %vm1420_vm6, %vm1421_vm5 }
 0x613   :  { %v1417_v22 = vsub.f32 1.0, %v1416_v20 }
 0x615   :  { %v1418_v24 = vmul.f32 %v1924_v19, %v1417_v22 }
 0x617   :  { %v1419_v18 = vadd.f32 %v1924_v19, %v1418_v24 }
 0x619   :  { %v1423_v1 = vsel %vm1422_vm7, %v1924_v19, %v1419_v18 }
 0x61a   :  { %v1428_v21 = vsel %vm1425_vm8, %v1427_v26, %v1423_v1 }
 0x61b   :  { %v1429_v27 = vmul.f32 %v1922_v16, %v1428_v21 }
 0x61d   :  { %1430 = vst [vmem:[%s2382_s13] sm:$0xff] %v1429_v27 }
 0x61e   :  { %1440 = vsyncpa [#allocation3], 1 }
 0x61f   :  { %1441 = vsyncpa [#allocation5], 1 }
 0x620   :  { %1442 = vsyncpa [#allocation8], 1 }
 0x621   :  { %1443 = vsyncpa [#allocation11], 1 }

</bundles_post_ra>
